<compile_context>
chip_gen: v5e
topology: v5e:2x2
jax: 0.10.0
libtpu: 0.0.40
codegen_flags: <defaults>
</compile_context>

<pallas_src>
import jax
import jax.numpy as jnp
from jax.experimental import pallas as pl
from jax.experimental.pallas import tpu as pltpu

HID_DIM = 128
INPUT_DIM = 10
Z_DIM = 8


def _toy_fc_ed_kernel(
    # activations (one batch tile each)
    x_ref, z_ref, r_ref,
    # encoder params (layer-1 weight split along the concat/K axis: [x | z | r])
    e_w1x_ref, e_w1z_ref, e_w1r_ref, e_b1_ref,
    e_w2_ref, e_b2_ref, e_w3_ref, e_b3_ref,
    # decoder params, past|future packed along the N (lane) axis
    d_w1x_ref, d_w1z_ref, d_b1_ref,
    d_w2_ref, d_b2_ref,
    dp_w3_ref, dp_b3_ref, df_w3_ref, df_b3_ref,
    # outputs
    x1_ref, x2_ref, x3_ref,
):
    f32 = jnp.float32
    x = x_ref[...]
    z = z_ref[...]
    r = r_ref[...]

    # ----- encoder: ReLU(cat([x, z, r]) @ W1 + b1) with the concat folded into
    # three split-K dots accumulating into the same f32 result.
    h = (jnp.dot(x, e_w1x_ref[...], preferred_element_type=f32)
         + jnp.dot(z, e_w1z_ref[...], preferred_element_type=f32)
         + jnp.dot(r, e_w1r_ref[...], preferred_element_type=f32)
         + e_b1_ref[...])
    h = jnp.maximum(h, 0.0)
    h = jnp.maximum(
        jnp.dot(h, e_w2_ref[...], preferred_element_type=f32) + e_b2_ref[...], 0.0)
    x2 = jnp.dot(h, e_w3_ref[...], preferred_element_type=f32) + e_b3_ref[...]
    x2_ref[...] = x2.astype(x2_ref.dtype)

    # ----- both decoders, packed 256 lanes wide. x2 stays in vregs (no HBM trip).
    # layer 1: shared input [x2 | z], weight (10,256)+(8,256) = [W1_past | W1_fut]
    d = (jnp.dot(x2, d_w1x_ref[...], preferred_element_type=f32)
         + jnp.dot(z, d_w1z_ref[...], preferred_element_type=f32)
         + d_b1_ref[...])
    d = jnp.maximum(d, 0.0)                                              # (bt, 256)
    # layer 2: block-diagonal (256,256) weight -> one full-width MXU pass
    d = jnp.maximum(
        jnp.dot(d, d_w2_ref[...], preferred_element_type=f32) + d_b2_ref[...], 0.0)
    # layer 3: lane-aligned 128-wide slices, one small dot per decoder head
    dp = d[:, :HID_DIM]
    df = d[:, HID_DIM:]
    x1_ref[...] = (jnp.dot(dp, dp_w3_ref[...], preferred_element_type=f32)
                   + dp_b3_ref[...]).astype(x1_ref.dtype)
    x3_ref[...] = (jnp.dot(df, df_w3_ref[...], preferred_element_type=f32)
                   + df_b3_ref[...]).astype(x3_ref.dtype)


def _pick_batch_tile(B):
    for t in (512, 256, 128, 64, 32, 16, 8):
        if B >= t and B % t == 0:
            return t
    return B  # full-batch block (satisfies the (8,128) rule by equaling the dim)


def toy_fc_ed_forward(x, z, r, packed_params):
    """x: (B, 10), z: (B, 8) codemaps_z, r: (B, 8) codemaps_r. Returns (x1, x2, x3)."""
    B = x.shape[0]
    bt = _pick_batch_tile(B)
    grid = (B // bt,)

    weights = packed_params  # 17 pre-packed 2-D arrays (see pack_params)

    def act_spec(feat):
        return pl.BlockSpec((bt, feat), lambda i: (i, 0))

    def w_spec(a):
        # full-array block, constant index_map -> weights stay VMEM-resident
        return pl.BlockSpec(a.shape, lambda i: (0, 0))

    in_specs = ([act_spec(INPUT_DIM), act_spec(Z_DIM), act_spec(Z_DIM)]
                + [w_spec(w) for w in weights])
    out_spec = pl.BlockSpec((bt, INPUT_DIM), lambda i: (i, 0))
    out_shape = tuple(jax.ShapeDtypeStruct((B, INPUT_DIM), jnp.float32)
                      for _ in range(3))

    x1, x2, x3 = pl.pallas_call(
        _toy_fc_ed_kernel,
        out_shape=out_shape,
        grid_spec=pltpu.PrefetchScalarGridSpec(
            num_scalar_prefetch=0,
            grid=grid,
            in_specs=in_specs,
            out_specs=[out_spec, out_spec, out_spec],
        ),
        compiler_params=pltpu.CompilerParams(
            dimension_semantics=("parallel",)),
    )(x, z, r, *weights)
    return x1, x2, x3


# ---------------- parameter init / packing (done once, off the forward path) ----


def _init_linear(key, in_dim, out_dim):
    """Mimics init_weights: weight ~ N(0, 0.001), bias ~ N(0, 0.001)."""
    kw, kb = jax.random.split(key)
    w = jax.random.normal(kw, (in_dim, out_dim), jnp.float32) * 0.001
    b = jax.random.normal(kb, (1, out_dim), jnp.float32) * 0.001
    return w, b


def _init_mlp3(key, in_dim, out_dim):
    k1, k2, k3 = jax.random.split(key, 3)
    return (_init_linear(k1, in_dim, HID_DIM),
            _init_linear(k2, HID_DIM, HID_DIM),
            _init_linear(k3, HID_DIM, out_dim))


def pack_params(enc, decp, decf):
    (e_w1, e_b1), (e_w2, e_b2), (e_w3, e_b3) = enc
    (p_w1, p_b1), (p_w2, p_b2), (p_w3, p_b3) = decp
    (f_w1, f_b1), (f_w2, f_b2), (f_w3, f_b3) = decf

    # encoder layer-1 split along the concat (K) axis: [x | z | r]
    e_w1x = e_w1[:INPUT_DIM]                       # (10, 128)
    e_w1z = e_w1[INPUT_DIM:INPUT_DIM + Z_DIM]      # (8, 128)
    e_w1r = e_w1[INPUT_DIM + Z_DIM:]               # (8, 128)

    # decoders packed side-by-side along N (256 lanes wide on layers 1 & 2)
    d_w1x = jnp.concatenate([p_w1[:INPUT_DIM], f_w1[:INPUT_DIM]], axis=1)  # (10, 256)
    d_w1z = jnp.concatenate([p_w1[INPUT_DIM:], f_w1[INPUT_DIM:]], axis=1)  # (8, 256)
    d_b1 = jnp.concatenate([p_b1, f_b1], axis=1)                           # (1, 256)
    d_w2 = jnp.zeros((2 * HID_DIM, 2 * HID_DIM), jnp.float32)
    d_w2 = d_w2.at[:HID_DIM, :HID_DIM].set(p_w2).at[HID_DIM:, HID_DIM:].set(f_w2)
    d_b2 = jnp.concatenate([p_b2, f_b2], axis=1)                           # (1, 256)

    return (e_w1x, e_w1z, e_w1r, e_b1, e_w2, e_b2, e_w3, e_b3,
            d_w1x, d_w1z, d_b1, d_w2, d_b2, p_w3, p_b3, f_w3, f_b3)


# ---------------- pure-JAX reference (mirrors the PyTorch module) -------------


def _mlp3_ref(h, params):
    (w1, b1), (w2, b2), (w3, b3) = params
    h = jnp.maximum(h @ w1 + b1, 0.0)
    h = jnp.maximum(h @ w2 + b2, 0.0)
    return h @ w3 + b3


if __name__ == "__main__":
    key = jax.random.PRNGKey(0)
    k_enc, k_decp, k_decf, kx, kz, kr = jax.random.split(key, 6)

    B = 4
    enc = _init_mlp3(k_enc, INPUT_DIM + 2 * Z_DIM, INPUT_DIM)   # 26 -> 128 -> 128 -> 10
    decp = _init_mlp3(k_decp, INPUT_DIM + Z_DIM, INPUT_DIM)     # 18 -> 128 -> 128 -> 10
    decf = _init_mlp3(k_decf, INPUT_DIM + Z_DIM, INPUT_DIM)     # 18 -> 128 -> 128 -> 10
    packed = jax.tree.map(jax.device_put, pack_params(enc, decp, decf))

    x = jax.random.normal(kx, (B, INPUT_DIM), jnp.float32)
    z = jax.random.normal(kz, (B, Z_DIM), jnp.float32)   # codemaps_z (passed-in z)
    r = jax.random.normal(kr, (B, Z_DIM), jnp.float32)   # codemaps_r (fresh random code map)

    fwd = jax.jit(toy_fc_ed_forward)
    x1, x2, x3 = fwd(x, z, r, packed)
    jax.block_until_ready((x1, x2, x3))

    # Correctness check against pure-JAX reference on the unpacked parameters.
    x2_ref = _mlp3_ref(jnp.concatenate([x, z, r], -1), enc)
    x1_ref = _mlp3_ref(jnp.concatenate([x2_ref, z], -1), decp)
    x3_ref = _mlp3_ref(jnp.concatenate([x2_ref, z], -1), decf)
    assert x1.shape == (B, INPUT_DIM) and x2.shape == (B, INPUT_DIM) and x3.shape == (B, INPUT_DIM)
    assert jnp.allclose(x2, x2_ref, atol=1e-6, rtol=1e-5), float(jnp.max(jnp.abs(x2 - x2_ref)))
    assert jnp.allclose(x1, x1_ref, atol=1e-6, rtol=1e-5), float(jnp.max(jnp.abs(x1 - x1_ref)))
    assert jnp.allclose(x3, x3_ref, atol=1e-6, rtol=1e-5), float(jnp.max(jnp.abs(x3 - x3_ref)))

    print("KERNEL_OK")
</pallas_src>

<mosaic_0001>
module attributes {stable_mosaic.version = 11 : i64} {
  func.func @_toy_fc_ed_kernel(%arg0: i32, %arg1: memref<4x10xf32, #tpu.memory_space<vmem>>, %arg2: memref<4x8xf32, #tpu.memory_space<vmem>>, %arg3: memref<4x8xf32, #tpu.memory_space<vmem>>, %arg4: memref<10x128xf32, #tpu.memory_space<vmem>>, %arg5: memref<8x128xf32, #tpu.memory_space<vmem>>, %arg6: memref<8x128xf32, #tpu.memory_space<vmem>>, %arg7: memref<1x128xf32, #tpu.memory_space<vmem>>, %arg8: memref<128x128xf32, #tpu.memory_space<vmem>>, %arg9: memref<1x128xf32, #tpu.memory_space<vmem>>, %arg10: memref<128x10xf32, #tpu.memory_space<vmem>>, %arg11: memref<1x10xf32, #tpu.memory_space<vmem>>, %arg12: memref<10x256xf32, #tpu.memory_space<vmem>>, %arg13: memref<8x256xf32, #tpu.memory_space<vmem>>, %arg14: memref<1x256xf32, #tpu.memory_space<vmem>>, %arg15: memref<256x256xf32, #tpu.memory_space<vmem>>, %arg16: memref<1x256xf32, #tpu.memory_space<vmem>>, %arg17: memref<128x10xf32, #tpu.memory_space<vmem>>, %arg18: memref<1x10xf32, #tpu.memory_space<vmem>>, %arg19: memref<128x10xf32, #tpu.memory_space<vmem>>, %arg20: memref<1x10xf32, #tpu.memory_space<vmem>>, %arg21: memref<4x10xf32, #tpu.memory_space<vmem>>, %arg22: memref<4x10xf32, #tpu.memory_space<vmem>>, %arg23: memref<4x10xf32, #tpu.memory_space<vmem>>) attributes {dimension_semantics = [#tpu.dimension_semantics<parallel>], iteration_bounds = array<i64: 1>, scalar_prefetch = 0 : i64, scratch_operands = 0 : i64, tpu.core_type = #tpu.core_type<tc>, window_params = [{transform_indices = @transform_0, window_bounds = array<i64: 4, 10>}, {transform_indices = @transform_1, window_bounds = array<i64: 4, 8>}, {transform_indices = @transform_2, window_bounds = array<i64: 4, 8>}, {pipeline_mode = #tpu.pipeline_mode<synchronous>, transform_indices = @transform_3, window_bounds = array<i64: 10, 128>}, {pipeline_mode = #tpu.pipeline_mode<synchronous>, transform_indices = @transform_4, window_bounds = array<i64: 8, 128>}, {pipeline_mode = #tpu.pipeline_mode<synchronous>, transform_indices = @transform_5, window_bounds = array<i64: 8, 128>}, {pipeline_mode = #tpu.pipeline_mode<synchronous>, transform_indices = @transform_6, window_bounds = array<i64: 1, 128>}, {pipeline_mode = #tpu.pipeline_mode<synchronous>, transform_indices = @transform_7, window_bounds = array<i64: 128, 128>}, {pipeline_mode = #tpu.pipeline_mode<synchronous>, transform_indices = @transform_8, window_bounds = array<i64: 1, 128>}, {pipeline_mode = #tpu.pipeline_mode<synchronous>, transform_indices = @transform_9, window_bounds = array<i64: 128, 10>}, {pipeline_mode = #tpu.pipeline_mode<synchronous>, transform_indices = @transform_10, window_bounds = array<i64: 1, 10>}, {pipeline_mode = #tpu.pipeline_mode<synchronous>, transform_indices = @transform_11, window_bounds = array<i64: 10, 256>}, {pipeline_mode = #tpu.pipeline_mode<synchronous>, transform_indices = @transform_12, window_bounds = array<i64: 8, 256>}, {pipeline_mode = #tpu.pipeline_mode<synchronous>, transform_indices = @transform_13, window_bounds = array<i64: 1, 256>}, {pipeline_mode = #tpu.pipeline_mode<synchronous>, transform_indices = @transform_14, window_bounds = array<i64: 256, 256>}, {pipeline_mode = #tpu.pipeline_mode<synchronous>, transform_indices = @transform_15, window_bounds = array<i64: 1, 256>}, {pipeline_mode = #tpu.pipeline_mode<synchronous>, transform_indices = @transform_16, window_bounds = array<i64: 128, 10>}, {pipeline_mode = #tpu.pipeline_mode<synchronous>, transform_indices = @transform_17, window_bounds = array<i64: 1, 10>}, {pipeline_mode = #tpu.pipeline_mode<synchronous>, transform_indices = @transform_18, window_bounds = array<i64: 128, 10>}, {pipeline_mode = #tpu.pipeline_mode<synchronous>, transform_indices = @transform_19, window_bounds = array<i64: 1, 10>}, {transform_indices = @transform_20, window_bounds = array<i64: 4, 10>}, {transform_indices = @transform_21, window_bounds = array<i64: 4, 10>}, {transform_indices = @transform_22, window_bounds = array<i64: 4, 10>}]} {
    %c0 = arith.constant 0 : index
    %c0_0 = arith.constant 0 : index
    %0 = vector.load %arg1[%c0, %c0_0] : memref<4x10xf32, #tpu.memory_space<vmem>>, vector<4x10xf32>
    %c0_1 = arith.constant 0 : index
    %c0_2 = arith.constant 0 : index
    %1 = vector.load %arg2[%c0_1, %c0_2] : memref<4x8xf32, #tpu.memory_space<vmem>>, vector<4x8xf32>
    %c0_3 = arith.constant 0 : index
    %c0_4 = arith.constant 0 : index
    %2 = vector.load %arg3[%c0_3, %c0_4] : memref<4x8xf32, #tpu.memory_space<vmem>>, vector<4x8xf32>
    %c0_5 = arith.constant 0 : index
    %c0_6 = arith.constant 0 : index
    %3 = vector.load %arg4[%c0_5, %c0_6] : memref<10x128xf32, #tpu.memory_space<vmem>>, vector<10x128xf32>
    %cst = arith.constant dense<0.000000e+00> : vector<4x128xf32>
    %4 = tpu.matmul %0, %3, %cst {dimension_numbers = #tpu.dot_dimension_numbers<[1], [0], [0], [1], [0, 0, 1, 1], [], []>} : vector<4x10xf32>, vector<10x128xf32>, vector<4x128xf32> -> vector<4x128xf32>
    %c0_7 = arith.constant 0 : index
    %c0_8 = arith.constant 0 : index
    %5 = vector.load %arg5[%c0_7, %c0_8] : memref<8x128xf32, #tpu.memory_space<vmem>>, vector<8x128xf32>
    %cst_9 = arith.constant dense<0.000000e+00> : vector<4x128xf32>
    %6 = tpu.matmul %1, %5, %cst_9 {dimension_numbers = #tpu.dot_dimension_numbers<[1], [0], [0], [1], [0, 0, 1, 1], [], []>} : vector<4x8xf32>, vector<8x128xf32>, vector<4x128xf32> -> vector<4x128xf32>
    %7 = arith.addf %4, %6 : vector<4x128xf32>
    %c0_10 = arith.constant 0 : index
    %c0_11 = arith.constant 0 : index
    %8 = vector.load %arg6[%c0_10, %c0_11] : memref<8x128xf32, #tpu.memory_space<vmem>>, vector<8x128xf32>
    %cst_12 = arith.constant dense<0.000000e+00> : vector<4x128xf32>
    %9 = tpu.matmul %2, %8, %cst_12 {dimension_numbers = #tpu.dot_dimension_numbers<[1], [0], [0], [1], [0, 0, 1, 1], [], []>} : vector<4x8xf32>, vector<8x128xf32>, vector<4x128xf32> -> vector<4x128xf32>
    %10 = arith.addf %7, %9 : vector<4x128xf32>
    %c0_13 = arith.constant 0 : index
    %c0_14 = arith.constant 0 : index
    %11 = vector.load %arg7[%c0_13, %c0_14] : memref<1x128xf32, #tpu.memory_space<vmem>>, vector<1x128xf32>
    %12 = vector.broadcast %11 : vector<1x128xf32> to vector<4x128xf32>
    %13 = arith.addf %10, %12 : vector<4x128xf32>
    %cst_15 = arith.constant 0.000000e+00 : f32
    %14 = vector.broadcast %cst_15 : f32 to vector<4x128xf32>
    %15 = arith.maximumf %13, %14 : vector<4x128xf32>
    %c0_16 = arith.constant 0 : index
    %c0_17 = arith.constant 0 : index
    %16 = vector.load %arg8[%c0_16, %c0_17] : memref<128x128xf32, #tpu.memory_space<vmem>>, vector<128x128xf32>
    %cst_18 = arith.constant dense<0.000000e+00> : vector<4x128xf32>
    %17 = tpu.matmul %15, %16, %cst_18 {dimension_numbers = #tpu.dot_dimension_numbers<[1], [0], [0], [1], [0, 0, 1, 1], [], []>} : vector<4x128xf32>, vector<128x128xf32>, vector<4x128xf32> -> vector<4x128xf32>
    %c0_19 = arith.constant 0 : index
    %c0_20 = arith.constant 0 : index
    %18 = vector.load %arg9[%c0_19, %c0_20] : memref<1x128xf32, #tpu.memory_space<vmem>>, vector<1x128xf32>
    %19 = vector.broadcast %18 : vector<1x128xf32> to vector<4x128xf32>
    %20 = arith.addf %17, %19 : vector<4x128xf32>
    %cst_21 = arith.constant 0.000000e+00 : f32
    %21 = vector.broadcast %cst_21 : f32 to vector<4x128xf32>
    %22 = arith.maximumf %20, %21 : vector<4x128xf32>
    %c0_22 = arith.constant 0 : index
    %c0_23 = arith.constant 0 : index
    %23 = vector.load %arg10[%c0_22, %c0_23] : memref<128x10xf32, #tpu.memory_space<vmem>>, vector<128x10xf32>
    %cst_24 = arith.constant dense<0.000000e+00> : vector<4x10xf32>
    %24 = tpu.matmul %22, %23, %cst_24 {dimension_numbers = #tpu.dot_dimension_numbers<[1], [0], [0], [1], [0, 0, 1, 1], [], []>} : vector<4x128xf32>, vector<128x10xf32>, vector<4x10xf32> -> vector<4x10xf32>
    %c0_25 = arith.constant 0 : index
    %c0_26 = arith.constant 0 : index
    %25 = vector.load %arg11[%c0_25, %c0_26] : memref<1x10xf32, #tpu.memory_space<vmem>>, vector<1x10xf32>
    %26 = vector.broadcast %25 : vector<1x10xf32> to vector<4x10xf32>
    %27 = arith.addf %24, %26 : vector<4x10xf32>
    %c0_27 = arith.constant 0 : index
    %c0_28 = arith.constant 0 : index
    %28 = vector.load %arg22[%c0_27, %c0_28] : memref<4x10xf32, #tpu.memory_space<vmem>>, vector<4x10xf32>
    tpu.vector_store %arg22[%c0_27, %c0_28], %27 {strides = array<i32>} : memref<4x10xf32, #tpu.memory_space<vmem>>, vector<4x10xf32>,
    %c0_29 = arith.constant 0 : index
    %c0_30 = arith.constant 0 : index
    %29 = vector.load %arg12[%c0_29, %c0_30] : memref<10x256xf32, #tpu.memory_space<vmem>>, vector<10x256xf32>
    %cst_31 = arith.constant dense<0.000000e+00> : vector<4x256xf32>
    %30 = tpu.matmul %27, %29, %cst_31 {dimension_numbers = #tpu.dot_dimension_numbers<[1], [0], [0], [1], [0, 0, 1, 1], [], []>} : vector<4x10xf32>, vector<10x256xf32>, vector<4x256xf32> -> vector<4x256xf32>
    %c0_32 = arith.constant 0 : index
    %c0_33 = arith.constant 0 : index
    %31 = vector.load %arg13[%c0_32, %c0_33] : memref<8x256xf32, #tpu.memory_space<vmem>>, vector<8x256xf32>
    %cst_34 = arith.constant dense<0.000000e+00> : vector<4x256xf32>
    %32 = tpu.matmul %1, %31, %cst_34 {dimension_numbers = #tpu.dot_dimension_numbers<[1], [0], [0], [1], [0, 0, 1, 1], [], []>} : vector<4x8xf32>, vector<8x256xf32>, vector<4x256xf32> -> vector<4x256xf32>
    %33 = arith.addf %30, %32 : vector<4x256xf32>
    %c0_35 = arith.constant 0 : index
    %c0_36 = arith.constant 0 : index
    %34 = vector.load %arg14[%c0_35, %c0_36] : memref<1x256xf32, #tpu.memory_space<vmem>>, vector<1x256xf32>
    %35 = vector.broadcast %34 : vector<1x256xf32> to vector<4x256xf32>
    %36 = arith.addf %33, %35 : vector<4x256xf32>
    %cst_37 = arith.constant 0.000000e+00 : f32
    %37 = vector.broadcast %cst_37 : f32 to vector<4x256xf32>
    %38 = arith.maximumf %36, %37 : vector<4x256xf32>
    %c0_38 = arith.constant 0 : index
    %c0_39 = arith.constant 0 : index
    %39 = vector.load %arg15[%c0_38, %c0_39] : memref<256x256xf32, #tpu.memory_space<vmem>>, vector<256x256xf32>
    %cst_40 = arith.constant dense<0.000000e+00> : vector<4x256xf32>
    %40 = tpu.matmul %38, %39, %cst_40 {dimension_numbers = #tpu.dot_dimension_numbers<[1], [0], [0], [1], [0, 0, 1, 1], [], []>} : vector<4x256xf32>, vector<256x256xf32>, vector<4x256xf32> -> vector<4x256xf32>
    %c0_41 = arith.constant 0 : index
    %c0_42 = arith.constant 0 : index
    %41 = vector.load %arg16[%c0_41, %c0_42] : memref<1x256xf32, #tpu.memory_space<vmem>>, vector<1x256xf32>
    %42 = vector.broadcast %41 : vector<1x256xf32> to vector<4x256xf32>
    %43 = arith.addf %40, %42 : vector<4x256xf32>
    %cst_43 = arith.constant 0.000000e+00 : f32
    %44 = vector.broadcast %cst_43 : f32 to vector<4x256xf32>
    %45 = arith.maximumf %43, %44 : vector<4x256xf32>
    %46 = vector.extract_strided_slice %45 {offsets = [0, 0], sizes = [4, 128], strides = [1, 1]} : vector<4x256xf32> to vector<4x128xf32>
    %47 = vector.extract_strided_slice %45 {offsets = [0, 128], sizes = [4, 128], strides = [1, 1]} : vector<4x256xf32> to vector<4x128xf32>
    %c0_44 = arith.constant 0 : index
    %c0_45 = arith.constant 0 : index
    %48 = vector.load %arg17[%c0_44, %c0_45] : memref<128x10xf32, #tpu.memory_space<vmem>>, vector<128x10xf32>
    %cst_46 = arith.constant dense<0.000000e+00> : vector<4x10xf32>
    %49 = tpu.matmul %46, %48, %cst_46 {dimension_numbers = #tpu.dot_dimension_numbers<[1], [0], [0], [1], [0, 0, 1, 1], [], []>} : vector<4x128xf32>, vector<128x10xf32>, vector<4x10xf32> -> vector<4x10xf32>
    %c0_47 = arith.constant 0 : index
    %c0_48 = arith.constant 0 : index
    %50 = vector.load %arg18[%c0_47, %c0_48] : memref<1x10xf32, #tpu.memory_space<vmem>>, vector<1x10xf32>
    %51 = vector.broadcast %50 : vector<1x10xf32> to vector<4x10xf32>
    %52 = arith.addf %49, %51 : vector<4x10xf32>
    %c0_49 = arith.constant 0 : index
    %c0_50 = arith.constant 0 : index
    %53 = vector.load %arg21[%c0_49, %c0_50] : memref<4x10xf32, #tpu.memory_space<vmem>>, vector<4x10xf32>
    tpu.vector_store %arg21[%c0_49, %c0_50], %52 {strides = array<i32>} : memref<4x10xf32, #tpu.memory_space<vmem>>, vector<4x10xf32>,
    %c0_51 = arith.constant 0 : index
    %c0_52 = arith.constant 0 : index
    %54 = vector.load %arg19[%c0_51, %c0_52] : memref<128x10xf32, #tpu.memory_space<vmem>>, vector<128x10xf32>
    %cst_53 = arith.constant dense<0.000000e+00> : vector<4x10xf32>
    %55 = tpu.matmul %47, %54, %cst_53 {dimension_numbers = #tpu.dot_dimension_numbers<[1], [0], [0], [1], [0, 0, 1, 1], [], []>} : vector<4x128xf32>, vector<128x10xf32>, vector<4x10xf32> -> vector<4x10xf32>
    %c0_54 = arith.constant 0 : index
    %c0_55 = arith.constant 0 : index
    %56 = vector.load %arg20[%c0_54, %c0_55] : memref<1x10xf32, #tpu.memory_space<vmem>>, vector<1x10xf32>
    %57 = vector.broadcast %56 : vector<1x10xf32> to vector<4x10xf32>
    %58 = arith.addf %55, %57 : vector<4x10xf32>
    %c0_56 = arith.constant 0 : index
    %c0_57 = arith.constant 0 : index
    %59 = vector.load %arg23[%c0_56, %c0_57] : memref<4x10xf32, #tpu.memory_space<vmem>>, vector<4x10xf32>
    tpu.vector_store %arg23[%c0_56, %c0_57], %58 {strides = array<i32>} : memref<4x10xf32, #tpu.memory_space<vmem>>, vector<4x10xf32>,
    return
  }
  func.func @transform_0(%arg0: i32) -> (i32, i32) {
    %c0_i32 = arith.constant 0 : i32
    %c0_i32_0 = arith.constant 0 : i32
    return %arg0, %c0_i32 : i32, i32
  }
  func.func @transform_1(%arg0: i32) -> (i32, i32) {
    %c0_i32 = arith.constant 0 : i32
    %c0_i32_0 = arith.constant 0 : i32
    return %arg0, %c0_i32 : i32, i32
  }
  func.func @transform_2(%arg0: i32) -> (i32, i32) {
    %c0_i32 = arith.constant 0 : i32
    %c0_i32_0 = arith.constant 0 : i32
    return %arg0, %c0_i32 : i32, i32
  }
  func.func @transform_3(%arg0: i32) -> (i32, i32) {
    %c0_i32 = arith.constant 0 : i32
    %c0_i32_0 = arith.constant 0 : i32
    %c0_i32_1 = arith.constant 0 : i32
    return %c0_i32, %c0_i32_0 : i32, i32
  }
  func.func @transform_4(%arg0: i32) -> (i32, i32) {
    %c0_i32 = arith.constant 0 : i32
    %c0_i32_0 = arith.constant 0 : i32
    %c0_i32_1 = arith.constant 0 : i32
    return %c0_i32, %c0_i32_0 : i32, i32
  }
  func.func @transform_5(%arg0: i32) -> (i32, i32) {
    %c0_i32 = arith.constant 0 : i32
    %c0_i32_0 = arith.constant 0 : i32
    %c0_i32_1 = arith.constant 0 : i32
    return %c0_i32, %c0_i32_0 : i32, i32
  }
  func.func @transform_6(%arg0: i32) -> (i32, i32) {
    %c0_i32 = arith.constant 0 : i32
    %c0_i32_0 = arith.constant 0 : i32
    %c0_i32_1 = arith.constant 0 : i32
    return %c0_i32, %c0_i32_0 : i32, i32
  }
  func.func @transform_7(%arg0: i32) -> (i32, i32) {
    %c0_i32 = arith.constant 0 : i32
    %c0_i32_0 = arith.constant 0 : i32
    %c0_i32_1 = arith.constant 0 : i32
    return %c0_i32, %c0_i32_0 : i32, i32
  }
  func.func @transform_8(%arg0: i32) -> (i32, i32) {
    %c0_i32 = arith.constant 0 : i32
    %c0_i32_0 = arith.constant 0 : i32
    %c0_i32_1 = arith.constant 0 : i32
    return %c0_i32, %c0_i32_0 : i32, i32
  }
  func.func @transform_9(%arg0: i32) -> (i32, i32) {
    %c0_i32 = arith.constant 0 : i32
    %c0_i32_0 = arith.constant 0 : i32
    %c0_i32_1 = arith.constant 0 : i32
    return %c0_i32, %c0_i32_0 : i32, i32
  }
  func.func @transform_10(%arg0: i32) -> (i32, i32) {
    %c0_i32 = arith.constant 0 : i32
    %c0_i32_0 = arith.constant 0 : i32
    %c0_i32_1 = arith.constant 0 : i32
    return %c0_i32, %c0_i32_0 : i32, i32
  }
  func.func @transform_11(%arg0: i32) -> (i32, i32) {
    %c0_i32 = arith.constant 0 : i32
    %c0_i32_0 = arith.constant 0 : i32
    %c0_i32_1 = arith.constant 0 : i32
    return %c0_i32, %c0_i32_0 : i32, i32
  }
  func.func @transform_12(%arg0: i32) -> (i32, i32) {
    %c0_i32 = arith.constant 0 : i32
    %c0_i32_0 = arith.constant 0 : i32
    %c0_i32_1 = arith.constant 0 : i32
    return %c0_i32, %c0_i32_0 : i32, i32
  }
  func.func @transform_13(%arg0: i32) -> (i32, i32) {
    %c0_i32 = arith.constant 0 : i32
    %c0_i32_0 = arith.constant 0 : i32
    %c0_i32_1 = arith.constant 0 : i32
    return %c0_i32, %c0_i32_0 : i32, i32
  }
  func.func @transform_14(%arg0: i32) -> (i32, i32) {
    %c0_i32 = arith.constant 0 : i32
    %c0_i32_0 = arith.constant 0 : i32
    %c0_i32_1 = arith.constant 0 : i32
    return %c0_i32, %c0_i32_0 : i32, i32
  }
  func.func @transform_15(%arg0: i32) -> (i32, i32) {
    %c0_i32 = arith.constant 0 : i32
    %c0_i32_0 = arith.constant 0 : i32
    %c0_i32_1 = arith.constant 0 : i32
    return %c0_i32, %c0_i32_0 : i32, i32
  }
  func.func @transform_16(%arg0: i32) -> (i32, i32) {
    %c0_i32 = arith.constant 0 : i32
    %c0_i32_0 = arith.constant 0 : i32
    %c0_i32_1 = arith.constant 0 : i32
    return %c0_i32, %c0_i32_0 : i32, i32
  }
  func.func @transform_17(%arg0: i32) -> (i32, i32) {
    %c0_i32 = arith.constant 0 : i32
    %c0_i32_0 = arith.constant 0 : i32
    %c0_i32_1 = arith.constant 0 : i32
    return %c0_i32, %c0_i32_0 : i32, i32
  }
  func.func @transform_18(%arg0: i32) -> (i32, i32) {
    %c0_i32 = arith.constant 0 : i32
    %c0_i32_0 = arith.constant 0 : i32
    %c0_i32_1 = arith.constant 0 : i32
    return %c0_i32, %c0_i32_0 : i32, i32
  }
  func.func @transform_19(%arg0: i32) -> (i32, i32) {
    %c0_i32 = arith.constant 0 : i32
    %c0_i32_0 = arith.constant 0 : i32
    %c0_i32_1 = arith.constant 0 : i32
    return %c0_i32, %c0_i32_0 : i32, i32
  }
  func.func @transform_20(%arg0: i32) -> (i32, i32) {
    %c0_i32 = arith.constant 0 : i32
    %c0_i32_0 = arith.constant 0 : i32
    return %arg0, %c0_i32 : i32, i32
  }
  func.func @transform_21(%arg0: i32) -> (i32, i32) {
    %c0_i32 = arith.constant 0 : i32
    %c0_i32_0 = arith.constant 0 : i32
    return %arg0, %c0_i32 : i32, i32
  }
  func.func @transform_22(%arg0: i32) -> (i32, i32) {
    %c0_i32 = arith.constant 0 : i32
    %c0_i32_0 = arith.constant 0 : i32
    return %arg0, %c0_i32 : i32, i32
  }
}

</mosaic_0001>

<bundles_post_ra>
// kernel: toy_fc_ed_forward.1
= control target key start
LH: loop header
LB: loop body
LE: loop exit
PB: predicated region body
PF: predicated region fallthrough
CT: control target
= control target key end

     0   :  { %s1171_s0 = inlined_call_operand.vmem [shape: f32[4,10], index: 0, kind: input, shape index: {}]   ;;  %s1172_s1 = inlined_call_operand.vmem [shape: f32[4,8], index: 1, kind: input, shape index: {}]   ;;  %s1173_s2 = inlined_call_operand.vmem [shape: f32[4,8], index: 2, kind: input, shape index: {}]   ;;  %s1174_s3 = inlined_call_operand.vmem [shape: f32[10,128], index: 3, kind: input, shape index: {}]   ;;  %s1175_s4 = inlined_call_operand.vmem [shape: f32[8,128], index: 4, kind: input, shape index: {}]   ;;  %s1176_s5 = inlined_call_operand.vmem [shape: f32[8,128], index: 5, kind: input, shape index: {}]   ;;  %s1177_s6 = inlined_call_operand.vmem [shape: f32[1,128], index: 6, kind: input, shape index: {}]   ;;  %s1178_s7 = inlined_call_operand.vmem [shape: f32[128,128], index: 7, kind: input, shape index: {}]   ;;  %s1179_s8 = inlined_call_operand.vmem [shape: f32[1,128], index: 8, kind: input, shape index: {}]   ;;  %s1180_s9 = inlined_call_operand.vmem [shape: f32[128,10], index: 9, kind: input, shape index: {}]   ;;  %s1181_s10 = inlined_call_operand.vmem [shape: f32[1,10], index: 10, kind: input, shape index: {}]   ;;  %s1182_s11 = inlined_call_operand.vmem [shape: f32[10,256], index: 11, kind: input, shape index: {}]   ;;  %s1183_s12 = inlined_call_operand.vmem [shape: f32[8,256], index: 12, kind: input, shape index: {}]   ;;  %s1184_s13 = inlined_call_operand.vmem [shape: f32[1,256], index: 13, kind: input, shape index: {}]   ;;  %s1185_s14 = inlined_call_operand.hbm [shape: f32[256,256], index: 14, kind: input, shape index: {}]   ;;  %s1186_s15 = inlined_call_operand.vmem [shape: f32[1,256], index: 15, kind: input, shape index: {}]   ;;  %s1187_s16 = inlined_call_operand.vmem [shape: f32[128,10], index: 16, kind: input, shape index: {}]   ;;  %s1188_s17 = inlined_call_operand.vmem [shape: f32[1,10], index: 17, kind: input, shape index: {}]   ;;  %s1189_s18 = inlined_call_operand.vmem [shape: f32[128,10], index: 18, kind: input, shape index: {}]   ;;  %s1190_s19 = inlined_call_operand.vmem [shape: f32[1,10], index: 19, kind: input, shape index: {}]   ;;  %s1191_s20 = inlined_call_operand.hbm [shape: f32[4,10], index: 20, kind: output, shape index: {0}]   ;;  %s1192_s21 = inlined_call_operand.hbm [shape: f32[4,10], index: 21, kind: output, shape index: {1}]   ;;  %s1193_s22 = inlined_call_operand.hbm [shape: f32[4,10], index: 22, kind: output, shape index: {2}]  }
   0x1   :  { %1195 = sst [smem:[#allocation12_spill]] %s1171_s0 }
   0x2   :  { %1196 = sst [smem:[#allocation13_spill]] %s1172_s1 }
   0x3   :  { %1197 = sst [smem:[#allocation14_spill]] %s1173_s2 }
   0x4   :  { %1198 = sst [smem:[#allocation15_spill]] %s1174_s3 }
   0x5   :  { %1199 = sst [smem:[#allocation16_spill]] %s1175_s4 }
   0x6   :  { %1200 = sst [smem:[#allocation17_spill]] %s1176_s5 }
   0x7   :  { %1201 = sst [smem:[#allocation18_spill]] %s1177_s6 }
   0x8   :  { %28 = vsyncpa [#allocation3], 0 }
   0x9   :  { %29 = vsyncpa [#allocation4], 0 }
   0xa   :  { %30 = vsyncpa [#allocation7], 0  ;;  %s63_s29 = sshll.u32 %s1185_s14, 4  ;;  %s768_s30 = smov [#allocation2]   ;;  %s64_s29 = int_to_ptr.hbm [resolvable:$true] %s63_s29 }
   0xb   :  { %s65_s4 = sshll.u32 %s768_s30, 4  ;;  %s769_s0 = smov 256   ;;  %s66_s4 = int_to_ptr.vmem [resolvable:$true] %s65_s4 }
   0xc   :  { %s770_s23 = smov 16  }
   0xd   :  { %71 = dma.hbm_to_vmem [thread:$0]  %s64_s29, 8192, %s66_s4, [#allocation3], %s769_s0, %s769_s0, %s770_s23  }
   0xe   :  { %762 = dma.done.wait [#allocation3], 8192  }
   0xf   :  { %763 = vsyncadd [#allocation3], 4294959104  ;;  %vm120_vm0 = vcmask 1041408   ;;  %vm92_vm1 = vcmask 64512   ;;  %s1202_s24 = sld [smem:[#allocation15_spill]]  ;;  %vm116_vm2 = vcmask 80896  }
  0x10   :  { %s1203_s26 = sld [smem:[#allocation16_spill]]  ;;  %v190_v6 = vld [vmem:[%s1178_s7 + $0x78] sm:$0xff]  ;;  %v189_v7 = vld [vmem:[%s1178_s7 + $0x70] sm:$0xff]  ;;  %v188_v8 = vld [vmem:[%s1178_s7 + $0x68] sm:$0xff]  ;;  %vm256_vm3 = vcmask 76800   ;;  %s772_s6 = smov [#allocation8]  }
  0x11   :  { %s1204_s28 = sld [smem:[#allocation13_spill]]  ;;  %v187_v10 = vld [vmem:[%s1178_s7 + $0x60] sm:$0xff]  ;;  %v186_v11 = vld [vmem:[%s1178_s7 + $0x58] sm:$0xff]  ;;  %v185_v12 = vld [vmem:[%s1178_s7 + $0x50] sm:$0xff]  ;;  %s624_s25 = sshll.u32 %s772_s6, 4  ;;  %s625_s25 = int_to_ptr.vmem [resolvable:$true] %s624_s25 }
  0x12   :  { %s1205_s4 = sld [smem:[#allocation12_spill]]  ;;  %v184_v13 = vld [vmem:[%s1178_s7 + $0x48] sm:$0xff]  ;;  %v183_v14 = vld [vmem:[%s1178_s7 + $0x40] sm:$0xff]  ;;  %v182_v15 = vld [vmem:[%s1178_s7 + $0x38] sm:$0xff]  ;;  %s626_s14 = sshll.u32 %s1193_s22, 4  ;;  %s627_s14 = int_to_ptr.hbm [resolvable:$true] %s626_s14 }
  0x13   :  { %s1206_s1 = sld [smem:[#allocation17_spill]]  ;;  %v181_v16 = vld [vmem:[%s1178_s7 + $0x30] sm:$0xff]  ;;  %v180_v17 = vld [vmem:[%s1178_s7 + $0x28] sm:$0xff]  ;;  %v179_v18 = vld [vmem:[%s1178_s7 + $0x20] sm:$0xff]  ;;  %s773_s27 = smov [#allocation5]  }
  0x14   :  { %s1207_s3 = sld [smem:[#allocation14_spill]]  ;;  %v178_v19 = vld [vmem:[%s1178_s7 + $0x18] sm:$0xff]  ;;  %v177_v20 = vld [vmem:[%s1178_s7 + $0x10] sm:$0xff]  ;;  %v176_v21 = vld [vmem:[%s1178_s7 + $0x8] sm:$0xff] }
  0x15   :  { %v90_v0 = vld [vmem:[%s1202_s24 + $0x8] sm:$0x3]  ;;  %v89_v2 = vld [vmem:[%s1202_s24] sm:$0xff]  ;;  %v231_v23 = vld [vmem:[%s1180_s9 + $0x78] sm:$0xff]  ;;  %s1208_s0 = sld [smem:[#allocation18_spill]] }
  0x16   :  { %v91_v1 = vld [vmem:[%s1203_s26] sm:$0xff]  ;;  %646 = vmatpush.msk.msra.mxu3 %vm120_vm0, %v90_v0  ;;  %v230_v24 = vld [vmem:[%s1180_s9 + $0x70] sm:$0xff]  ;;  %v229_v25 = vld [vmem:[%s1180_s9 + $0x68] sm:$0xff] }
  0x17   :  { %111 = vmatpush.msra.mxu0 %v91_v1  ;;  %v905_v3 = vld [vmem:[%s1204_s28] sm:$0xf]  ;;  %v227_v27 = vld [vmem:[%s1180_s9 + $0x58] sm:$0xff]  ;;  %v226_v28 = vld [vmem:[%s1180_s9 + $0x50] sm:$0xff] }
  0x18   :  { %v86_v4 = vld [vmem:[%s1205_s4] sm:$0xf]  ;;  %645 = vmatmul.msk.f32.vlgmr.msra.gmra.mxu0 %vm92_vm1, %v905_v3  ;;  %139 = vmatpush.msra.mxu3 %v89_v2  ;;  %v225_v29 = vld [vmem:[%s1180_s9 + $0x48] sm:$0xff]  ;;  %v223_v31 = vld [vmem:[%s1180_s9 + $0x38] sm:$0xff] }
  0x19   :  { %v144_v5 = vld [vmem:[%s1206_s1] sm:$0xff]  ;;  %647 = vmatmul.msk.f32.vlgmr.msra.gmra.mxu3 %vm116_vm2, %v86_v4  ;;  %v222_v33 = vld [vmem:[%s1180_s9 + $0x30] sm:$0xff]  ;;  %v221_v34 = vld [vmem:[%s1180_s9 + $0x28] sm:$0xff] }
  0x1a   :  { %163 = vmatpush.msrb.mxu0 %v144_v5  ;;  %195 = vmatpush.msrb.mxu3 %v190_v6  ;;  %v88_v9 = vld [vmem:[%s1207_s3] sm:$0xf]  ;;  %v219_v36 = vld [vmem:[%s1180_s9 + $0x18] sm:$0xff]  ;;  %v218_v44 = vld [vmem:[%s1180_s9 + $0x10] sm:$0xff]  ;;  %s602_s3 = sshll.u32 %s773_s27, 4  ;;  %s603_s3 = int_to_ptr.vmem [resolvable:$true] %s602_s3 }
  0x1b   :  { %v175_v22 = vld [vmem:[%s1178_s7] sm:$0xff]  ;;  %v217_v45 = vld [vmem:[%s1180_s9 + $0x8] sm:$0xff]  ;;  %v260_v49 = vld [vmem:[%s1182_s11 + $0x10] sm:$0x3] }
  0x1c   :  { %196 = vmatpush.msrb.mxu3 %v189_v7  ;;  %236 = vmatpush.msra.mxu0 %v231_v23  ;;  %v228_v26 = vld [vmem:[%s1180_s9 + $0x60] sm:$0xff]  ;;  %v263_v48 = vld [vmem:[%s1183_s12 + $0x8] sm:$0xff]  ;;  %v261_v55 = vld [vmem:[%s1182_s11 + $0x18] sm:$0x3] }
  0x1d   :  { %v224_v30 = vld [vmem:[%s1180_s9 + $0x40] sm:$0xff]  ;;  %299 = vmatpush.msra.mxu1 %v263_v48  ;;  %v259_v56 = vld [vmem:[%s1182_s11 + $0x8] sm:$0xff]  ;;  %v425_v57 = vld [vmem:[#allocation2 + $0x1f0] sm:$0xff] }
  0x1e   :  { %197 = vmatpush.msrb.mxu3 %v188_v8  ;;  %237 = vmatpush.msra.mxu0 %v230_v24  ;;  %v220_v35 = vld [vmem:[%s1180_s9 + $0x20] sm:$0xff]  ;;  %v426_v58 = vld [vmem:[#allocation2 + $0x1f8] sm:$0xff]  ;;  %v424_v60 = vld [vmem:[#allocation2 + $0x1e8] sm:$0xff] }
  0x1f   :  { %v661_v40 = vld [vmem:[%s1208_s0] ss:$0 sm:$0xff]  ;;  %650 = vmatmul.msk.f32.vlgmr.msra.gmra.mxu1 %vm92_vm1, %v905_v3  ;;  %v421_v61 = vld [vmem:[#allocation2 + $0x1d0] sm:$0xff]  ;;  %v422_v62 = vld [vmem:[#allocation2 + $0x1d8] sm:$0xff] }
  0x20   :  { %648 = vmatmul.msk.f32.vlgmr.msrb.gmra.mxu0 %vm92_vm1, %v88_v9  ;;  %198 = vmatpush.msrb.mxu3 %v187_v10  ;;  %v216_v46 = vld [vmem:[%s1180_s9] sm:$0xff]  ;;  %v393_v63 = vld [vmem:[#allocation2 + $0xf0] sm:$0xff]  ;;  %v394_v0 = vld [vmem:[#allocation2 + $0xf8] sm:$0xff]  ;;  %s604_s9 = sshll.u32 %s1191_s20, 4  ;;  %s605_s9 = int_to_ptr.hbm [resolvable:$true] %s604_s9 }
  0x21   :  { %238 = vmatpush.msra.mxu0 %v229_v25  ;;  %v262_v47 = vld [vmem:[%s1183_s12] sm:$0xff]  ;;  %653 = vmatpush.msk.msrb.mxu1 %vm120_vm0, %v261_v55  ;;  %v392_v4 = vld [vmem:[#allocation2 + $0xe8] sm:$0xff]  ;;  %v389_v5 = vld [vmem:[#allocation2 + $0xd0] sm:$0xff] }
  0x22   :  { %199 = vmatpush.msrb.mxu3 %v186_v11  ;;  %279 = vmatpush.msra.mxu2 %v262_v47  ;;  %v258_v50 = vld [vmem:[%s1182_s11] sm:$0xff]  ;;  %v390_v6 = vld [vmem:[#allocation2 + $0xd8] sm:$0xff]  ;;  %v417_v7 = vld [vmem:[#allocation2 + $0x1b0] sm:$0xff] }
  0x23   :  { %239 = vmatpush.msra.mxu0 %v228_v26  ;;  %649 = vmatmul.msk.f32.vlgmr.msra.gmra.mxu2 %vm92_vm1, %v905_v3  ;;  %v662_v51 = vld [vmem:[%s1179_s8] ss:$0 sm:$0xff]  ;;  %v420_v3 = vld [vmem:[#allocation2 + $0x1c8] sm:$0xff]  ;;  %v418_v8 = vld [vmem:[#allocation2 + $0x1b8] sm:$0xff] }
  0x24   :  { %200 = vmatpush.msrb.mxu3 %v185_v12  ;;  %651 = vmatpush.msk.msrb.mxu2 %vm120_vm0, %v260_v49  ;;  %v423_v59 = vld [vmem:[#allocation2 + $0x1e0] sm:$0xff]  ;;  %v388_v10 = vld [vmem:[#allocation2 + $0xc8] sm:$0xff]  ;;  %v409_v23 = vld [vmem:[#allocation2 + $0x170] sm:$0xff] }
  0x25   :  { %240 = vmatpush.msra.mxu0 %v227_v27  ;;  %348 = vmatpush.msrb.mxu1 %v259_v56  ;;  %v391_v1 = vld [vmem:[#allocation2 + $0xe0] sm:$0xff]  ;;  %v416_v12 = vld [vmem:[#allocation2 + $0x1a8] sm:$0xff]  ;;  %v410_v24 = vld [vmem:[#allocation2 + $0x178] sm:$0xff] }
  0x26   :  { %201 = vmatpush.msrb.mxu3 %v184_v13  ;;  %328 = vmatpush.msrb.mxu2 %v258_v50  ;;  %v419_v2 = vld [vmem:[#allocation2 + $0x1c0] sm:$0xff]  ;;  %v385_v13 = vld [vmem:[#allocation2 + $0xb0] sm:$0xff]  ;;  %v380_v26 = vld [vmem:[#allocation2 + $0x88] sm:$0xff] }
  0x27   :  { %241 = vmatpush.msra.mxu0 %v226_v28  ;;  %453 = vmatpush.msra.mxu1 %v425_v57  ;;  %v387_v9 = vld [vmem:[#allocation2 + $0xc0] sm:$0xff]  ;;  %v408_v28 = vld [vmem:[#allocation2 + $0x168] sm:$0xff]  ;;  %v397_v47 = vld [vmem:[#allocation2 + $0x110] sm:$0xff] }
  0x28   :  { %202 = vmatpush.msrb.mxu3 %v183_v14  ;;  %433 = vmatpush.msra.mxu2 %v393_v63  ;;  %v415_v11 = vld [vmem:[#allocation2 + $0x1a0] sm:$0xff]  ;;  %v386_v14 = vld [vmem:[#allocation2 + $0xb8] sm:$0xff]  ;;  %v372_v48 = vld [vmem:[#allocation2 + $0x48] sm:$0xff] }
  0x29   :  { %242 = vmatpush.msra.mxu0 %v225_v29  ;;  %454 = vmatpush.msra.mxu1 %v423_v59  ;;  %v379_v25 = vld [vmem:[#allocation2 + $0x80] sm:$0xff]  ;;  %v377_v29 = vld [vmem:[#allocation2 + $0x70] sm:$0xff]  ;;  %v398_v49 = vld [vmem:[#allocation2 + $0x118] sm:$0xff] }
  0x2a   :  { %203 = vmatpush.msrb.mxu3 %v182_v15  ;;  %434 = vmatpush.msra.mxu2 %v391_v1  ;;  %v413_v15 = vld [vmem:[#allocation2 + $0x190] sm:$0xff]  ;;  %v407_v27 = vld [vmem:[#allocation2 + $0x160] sm:$0xff]  ;;  %v368_v55 = vld [vmem:[#allocation2 + $0x28] sm:$0xff] }
  0x2b   :  { %243 = vmatpush.msra.mxu0 %v224_v30  ;;  %455 = vmatpush.msra.mxu1 %v421_v61  ;;  %v378_v30 = vld [vmem:[#allocation2 + $0x78] sm:$0xff]  ;;  %v369_v50 = vld [vmem:[#allocation2 + $0x30] sm:$0xff]  ;;  %v364_v59 = vld [vmem:[#allocation2 + $0x8] sm:$0xff] }
  0x2c   :  { %204 = vmatpush.msrb.mxu3 %v181_v16  ;;  %435 = vmatpush.msra.mxu2 %v389_v5  ;;  %v414_v16 = vld [vmem:[#allocation2 + $0x198] sm:$0xff]  ;;  %v365_v56 = vld [vmem:[#allocation2 + $0x10] sm:$0xff]  ;;  %v569_v1 = vld [vmem:[%s1189_s18 + $0x68] sm:$0xff] }
  0x2d   :  { %244 = vmatpush.msra.mxu0 %v223_v31  ;;  %456 = vmatpush.msra.mxu1 %v419_v2  ;;  %v405_v31 = vld [vmem:[#allocation2 + $0x150] sm:$0xff]  ;;  %v366_v57 = vld [vmem:[#allocation2 + $0x18] sm:$0xff]  ;;  %v527_v2 = vld [vmem:[%s1187_s16 + $0x60] sm:$0xff] }
  0x2e   :  { %205 = vmatpush.msrb.mxu3 %v180_v17  ;;  %436 = vmatpush.msra.mxu2 %v387_v9  ;;  %v383_v17 = vld [vmem:[#allocation2 + $0xa0] sm:$0xff]  ;;  %v571_v61 = vld [vmem:[%s1189_s18 + $0x78] sm:$0xff]  ;;  %v570_v63 = vld [vmem:[%s1189_s18 + $0x70] sm:$0xff] }
  0x2f   :  { %245 = vmatpush.msra.mxu0 %v222_v33  ;;  %457 = vmatpush.msra.mxu1 %v417_v7  ;;  %v403_v33 = vld [vmem:[#allocation2 + $0x140] sm:$0xff]  ;;  %v567_v5 = vld [vmem:[%s1189_s18 + $0x58] sm:$0xff]  ;;  %v566_v7 = vld [vmem:[%s1189_s18 + $0x50] sm:$0xff] }
  0x30   :  { %206 = vmatpush.msrb.mxu3 %v179_v18  ;;  %v384_v18 = vld [vmem:[#allocation2 + $0xa8] sm:$0xff]  ;;  %437 = vmatpush.msra.mxu2 %v385_v13 }
  0x31   :  { %246 = vmatpush.msra.mxu0 %v221_v34  ;;  %458 = vmatpush.msra.mxu1 %v415_v11  ;;  %v404_v34 = vld [vmem:[#allocation2 + $0x148] sm:$0xff] }
  0x32   :  { %207 = vmatpush.msrb.mxu3 %v178_v19  ;;  %v411_v19 = vld [vmem:[#allocation2 + $0x180] sm:$0xff]  ;;  %438 = vmatpush.msra.mxu2 %v383_v17 }
  0x33   :  { %247 = vmatpush.msra.mxu0 %v220_v35  ;;  %459 = vmatpush.msra.mxu1 %v413_v15  ;;  %v663_v35 = vld [vmem:[%s1181_s10] ss:$0 sm:$0xff] }
  0x34   :  { %208 = vmatpush.msrb.mxu3 %v177_v20  ;;  %v412_v20 = vld [vmem:[#allocation2 + $0x188] sm:$0xff] }
  0x35   :  { %248 = vmatpush.msra.mxu0 %v219_v36  ;;  %460 = vmatpush.msra.mxu1 %v411_v19 }
  0x36   :  { %209 = vmatpush.msrb.mxu3 %v176_v21  ;;  %v381_v21 = vld [vmem:[#allocation2 + $0x90] sm:$0xff] }
  0x37   :  { %249 = vmatpush.msra.mxu0 %v218_v44  ;;  %439 = vmatpush.msra.mxu2 %v381_v21  ;;  %v374_v44 = vld [vmem:[#allocation2 + $0x58] sm:$0xff]  ;;  %v524_v21 = vld [vmem:[%s1187_s16 + $0x48] sm:$0xff] }
  0x38   :  { %210 = vmatpush.msrb.mxu3 %v175_v22  ;;  %v382_v22 = vld [vmem:[#allocation2 + $0x98] sm:$0xff]  ;;  %461 = vmatpush.msra.mxu1 %v409_v23  ;;  %v523_v23 = vld [vmem:[%s1187_s16 + $0x40] sm:$0xff] }
  0x39   :  { %250 = vmatpush.msra.mxu0 %v217_v45  ;;  %440 = vmatpush.msra.mxu2 %v379_v25  ;;  %v400_v45 = vld [vmem:[#allocation2 + $0x128] sm:$0xff]  ;;  %v522_v25 = vld [vmem:[%s1187_s16 + $0x38] sm:$0xff] }
  0x3a   :  { %473 = vmatpush.msra.mxu3 %v394_v0  ;;  %462 = vmatpush.msra.mxu1 %v407_v27  ;;  %v528_v0 = vld [vmem:[%s1187_s16 + $0x68] sm:$0xff]  ;;  %v521_v27 = vld [vmem:[%s1187_s16 + $0x30] sm:$0xff] }
  0x3b   :  { %251 = vmatpush.msra.mxu0 %v216_v46  ;;  %441 = vmatpush.msra.mxu2 %v377_v29  ;;  %v371_v46 = vld [vmem:[#allocation2 + $0x40] sm:$0xff]  ;;  %v520_v29 = vld [vmem:[%s1187_s16 + $0x28] sm:$0xff] }
  0x3c   :  { %474 = vmatpush.msra.mxu3 %v392_v4  ;;  %463 = vmatpush.msra.mxu1 %v405_v31  ;;  %v526_v4 = vld [vmem:[%s1187_s16 + $0x58] sm:$0xff]  ;;  %v519_v31 = vld [vmem:[%s1187_s16 + $0x20] sm:$0xff] }
  0x3d   :  { %493 = vmatpush.msrb.mxu0 %v426_v58  ;;  %v363_v58 = vld [vmem:[#allocation2] sm:$0xff] }
  0x3e   :  { %475 = vmatpush.msra.mxu3 %v390_v6  ;;  %464 = vmatpush.msra.mxu1 %v403_v33  ;;  %v525_v6 = vld [vmem:[%s1187_s16 + $0x50] sm:$0xff]  ;;  %v518_v33 = vld [vmem:[%s1187_s16 + $0x18] sm:$0xff] }
  0x3f   :  { %494 = vmatpush.msrb.mxu0 %v424_v60  ;;  %v530_v60 = vld [vmem:[%s1187_s16 + $0x78] sm:$0xff] }
  0x40   :  { %476 = vmatpush.msra.mxu3 %v388_v10  ;;  %v353_v10 = vld [vmem:[%s1184_s13] sm:$0x3] }
  0x41   :  { %495 = vmatpush.msrb.mxu0 %v422_v62  ;;  %v529_v62 = vld [vmem:[%s1187_s16 + $0x70] sm:$0xff]  ;;  %v356_v11 = vperm.slane %v353_v10, 1 }
  0x42   :  { %477 = vmatpush.msra.mxu3 %v386_v14 }
  0x43   :  { %496 = vmatpush.msrb.mxu0 %v420_v3  ;;  %v568_v3 = vld [vmem:[%s1189_s18 + $0x60] sm:$0xff] }
  0x44   :  { %478 = vmatpush.msra.mxu3 %v384_v18 }
  0x45   :  { %497 = vmatpush.msrb.mxu0 %v418_v8 }
  0x46   :  { %479 = vmatpush.msra.mxu3 %v382_v22  ;;  %v565_v22 = vld [vmem:[%s1189_s18 + $0x48] sm:$0xff] }
  0x47   :  { %498 = vmatpush.msrb.mxu0 %v416_v12 }
  0x48   :  { %480 = vmatpush.msra.mxu3 %v380_v26  ;;  %v563_v26 = vld [vmem:[%s1189_s18 + $0x38] sm:$0xff] }
  0x49   :  { %499 = vmatpush.msrb.mxu0 %v414_v16  ;;  %v355_v16 = vperm.slane %v353_v10, 0 }
  0x4a   :  { %481 = vmatpush.msra.mxu3 %v378_v30  ;;  %v561_v30 = vld [vmem:[%s1189_s18 + $0x28] sm:$0xff] }
  0x4b   :  { %500 = vmatpush.msrb.mxu0 %v412_v20 }
  0x4d   :  { %501 = vmatpush.msrb.mxu0 %v410_v24  ;;  %v564_v24 = vld [vmem:[%s1189_s18 + $0x40] sm:$0xff] }
  0x4f   :  { %502 = vmatpush.msrb.mxu0 %v408_v28  ;;  %v562_v28 = vld [vmem:[%s1189_s18 + $0x30] sm:$0xff] }
  0x95   :  { %v113_v32 = vpop.f32.mrf.mxu0 }
  0x9c   :  { %v141_v37 = vpop.f32.mrf.mxu3  ;;  %v301_v8 = vpop.f32.mrf.mxu1 }
  0x9d   :  { %v165_v38 = vpop.f32.mrf.mxu0  ;;  %v142_v39 = vadd.f32 %v141_v37, %v113_v32  ;;  %v406_v32 = vld [vmem:[#allocation2 + $0x158] sm:$0xff] }
  0x9e   :  { %503 = vmatpush.msrb.mxu0 %v406_v32  ;;  %v560_v32 = vld [vmem:[%s1189_s18 + $0x20] sm:$0xff] }
  0x9f   :  { %v168_v41 = vadd.f32 %v165_v38, %v142_v39  ;;  %v375_v38 = vld [vmem:[#allocation2 + $0x60] sm:$0xff]  ;;  %v401_v39 = vld [vmem:[#allocation2 + $0x130] sm:$0xff] }
  0xa0   :  { %504 = vmatpush.msrb.mxu0 %v404_v34  ;;  %442 = vmatpush.msra.mxu2 %v375_v38  ;;  %v559_v34 = vld [vmem:[%s1189_s18 + $0x18] sm:$0xff]  ;;  %v557_v38 = vld [vmem:[%s1189_s18 + $0x8] sm:$0xff] }
  0xa1   :  { %v173_v42 = vadd.f32 %v661_v40, %v168_v41  ;;  %v376_v40 = vld [vmem:[#allocation2 + $0x68] sm:$0xff]  ;;  %465 = vmatpush.msra.mxu1 %v401_v39  ;;  %v402_v41 = vld [vmem:[#allocation2 + $0x138] sm:$0xff]  ;;  %v515_v39 = vld [vmem:[%s1187_s16] sm:$0xff] }
  0xa2   :  { %482 = vmatpush.msra.mxu3 %v376_v40  ;;  %505 = vmatpush.msrb.mxu0 %v402_v41  ;;  %v556_v40 = vld [vmem:[%s1189_s18] sm:$0xff] }
  0xa3   :  { %v174_v43 = vmax.f32 %v173_v42, 0.0  ;;  %v373_v42 = vld [vmem:[#allocation2 + $0x50] sm:$0xff]  ;;  %v427_v41 = vld [vmem:[%s1186_s15] sm:$0x3]  ;;  %s615_s15 = sshll.u32 %s1192_s21, 4  ;;  %s616_s15 = int_to_ptr.hbm [resolvable:$true] %s615_s15 }
  0xa4   :  { %443 = vmatpush.msra.mxu2 %v373_v42  ;;  %483 = vmatpush.msra.mxu3 %v374_v44  ;;  %v429_v42 = vperm.slane %v427_v41, 0 }
  0xa5   :  { %211 = vmatmul.f32.vlgmr.msrb.gmra.mxu3 %v174_v43  ;;  %v399_v43 = vld [vmem:[#allocation2 + $0x120] sm:$0xff]  ;;  %506 = vmatpush.msrb.mxu0 %v400_v45 }
  0xa6   :  { %466 = vmatpush.msra.mxu1 %v399_v43  ;;  %444 = vmatpush.msra.mxu2 %v371_v46  ;;  %v281_v9 = vpop.f32.mrf.mxu2  ;;  %v430_v43 = vperm.slane %v427_v41, 1 }
  0xa7   :  { %484 = vmatpush.msra.mxu3 %v372_v48  ;;  %507 = vmatpush.msrb.mxu0 %v398_v49 }
  0xa8   :  { %467 = vmatpush.msra.mxu1 %v397_v47  ;;  %445 = vmatpush.msra.mxu2 %v369_v50 }
 0x128   :  { %v212_v52 = vpop.f32.mrf.mxu3 }
 0x129   :  { %v213_v53 = vadd.f32 %v662_v51, %v212_v52  ;;  %v395_v51 = vld [vmem:[#allocation2 + $0x100] sm:$0xff]  ;;  %v370_v52 = vld [vmem:[#allocation2 + $0x38] sm:$0xff] }
 0x12a   :  { %468 = vmatpush.msra.mxu1 %v395_v51  ;;  %485 = vmatpush.msra.mxu3 %v370_v52 }
 0x12b   :  { %v215_v54 = vmax.f32 %v213_v53, 0.0  ;;  %v396_v53 = vld [vmem:[#allocation2 + $0x108] sm:$0xff] }
 0x12c   :  { %508 = vmatpush.msrb.mxu0 %v396_v53  ;;  %486 = vmatpush.msra.mxu3 %v368_v55 }
 0x12d   :  { %252 = vmatmul.f32.vlgmr.msra.gmra.mxu0 %v215_v54  ;;  %v367_v54 = vld [vmem:[#allocation2 + $0x20] sm:$0xff] }
 0x12e   :  { %446 = vmatpush.msra.mxu2 %v367_v54  ;;  %487 = vmatpush.msra.mxu3 %v366_v57  ;;  %v664_v54 = vld [vmem:[%s1190_s19] ss:$0 sm:$0xff] }
 0x12f   :  { %v665_v57 = vld [vmem:[%s1188_s17] ss:$0 sm:$0xff] }
 0x130   :  { %447 = vmatpush.msra.mxu2 %v365_v56  ;;  %488 = vmatpush.msra.mxu3 %v364_v59 }
 0x132   :  { %448 = vmatpush.msra.mxu2 %v363_v58 }
 0x1aa   :  { %v253_v36 = vpop.f32.mrf.mxu0 }
 0x1ab   :  { %v254_v37 = vadd.f32 %v663_v35, %v253_v36  ;;  %v517_v35 = vld [vmem:[%s1187_s16 + $0x10] sm:$0xff] }
 0x1ac   :  { %v558_v36 = vld [vmem:[%s1189_s18 + $0x10] sm:$0xff] }
 0x1ad   :  { %652 = vmatmul.msk.f32.vlgmr.msrb.gmra.mxu2 %vm116_vm2, %v254_v37  ;;  %654 = vmatmul.msk.f32.vlgmr.msrb.gmra.mxu1 %vm116_vm2, %v254_v37  ;;  %257 = vst.msk [vmem:[#allocation6] sm:$0xf] %vm256_vm3, %v254_v37  ;;  %v516_v37 = vld [vmem:[%s1187_s16 + $0x8] sm:$0xff]  ;;  %s771_s16 = smov [#allocation6]  }
 0x1ae   :  { %535 = vmatpush.msrb.mxu2 %v530_v60  ;;  %576 = vmatpush.msrb.mxu1 %v571_v61  ;;  %s613_s18 = sshll.u32 %s771_s16, 4  ;;  %s614_s18 = int_to_ptr.vmem [resolvable:$true] %s613_s18 }
 0x1af   :  { %618 = dma.vmem_to_hbm [thread:$0]  %s614_s18, 64, %s616_s15, [#allocation7]  }
 0x1b0   :  { %536 = vmatpush.msrb.mxu2 %v529_v62  ;;  %577 = vmatpush.msrb.mxu1 %v570_v63 }
 0x1b2   :  { %537 = vmatpush.msrb.mxu2 %v528_v0  ;;  %578 = vmatpush.msrb.mxu1 %v569_v1 }
 0x1b4   :  { %538 = vmatpush.msrb.mxu2 %v527_v2  ;;  %579 = vmatpush.msrb.mxu1 %v568_v3 }
 0x1b6   :  { %539 = vmatpush.msrb.mxu2 %v526_v4  ;;  %580 = vmatpush.msrb.mxu1 %v567_v5 }
 0x1b8   :  { %540 = vmatpush.msrb.mxu2 %v525_v6  ;;  %581 = vmatpush.msrb.mxu1 %v566_v7 }
 0x1ba   :  { %541 = vmatpush.msrb.mxu2 %v524_v21  ;;  %582 = vmatpush.msrb.mxu1 %v565_v22 }
 0x1bc   :  { %542 = vmatpush.msrb.mxu2 %v523_v23  ;;  %583 = vmatpush.msrb.mxu1 %v564_v24 }
 0x1be   :  { %543 = vmatpush.msrb.mxu2 %v522_v25  ;;  %584 = vmatpush.msrb.mxu1 %v563_v26 }
 0x1c0   :  { %544 = vmatpush.msrb.mxu2 %v521_v27  ;;  %585 = vmatpush.msrb.mxu1 %v562_v28 }
 0x1c2   :  { %545 = vmatpush.msrb.mxu2 %v520_v29  ;;  %586 = vmatpush.msrb.mxu1 %v561_v30 }
 0x1c4   :  { %546 = vmatpush.msrb.mxu2 %v519_v31  ;;  %587 = vmatpush.msrb.mxu1 %v560_v32 }
 0x1c6   :  { %547 = vmatpush.msrb.mxu2 %v518_v33  ;;  %588 = vmatpush.msrb.mxu1 %v559_v34 }
 0x1c8   :  { %548 = vmatpush.msrb.mxu2 %v517_v35  ;;  %589 = vmatpush.msrb.mxu1 %v558_v36 }
 0x1ca   :  { %549 = vmatpush.msrb.mxu2 %v516_v37  ;;  %590 = vmatpush.msrb.mxu1 %v557_v38 }
 0x1cc   :  { %550 = vmatpush.msrb.mxu2 %v515_v39  ;;  %591 = vmatpush.msrb.mxu1 %v556_v40 }
 0x22a   :  { %v350_v12 = vpop.f32.mrf.mxu1 }
 0x22b   :  { %v351_v13 = vadd.f32 %v350_v12, %v301_v8 }
 0x22d   :  { %v360_v14 = vadd.f32 %v356_v11, %v351_v13 }
 0x22f   :  { %v362_v15 = vmax.f32 %v360_v14, 0.0 }
 0x230   :  { %v330_v17 = vpop.f32.mrf.mxu2 }
 0x231   :  { %v331_v18 = vadd.f32 %v330_v17, %v281_v9  ;;  %469 = vmatmul.f32.vlgmr.msra.gmra.mxu1 %v362_v15  ;;  %509 = vmatmul.f32.vlgmr.msrb.gmra.mxu0 %v362_v15 }
 0x233   :  { %v359_v19 = vadd.f32 %v355_v16, %v331_v18 }
 0x235   :  { %v361_v20 = vmax.f32 %v359_v19, 0.0 }
 0x237   :  { %449 = vmatmul.f32.vlgmr.msra.gmra.mxu2 %v361_v20  ;;  %489 = vmatmul.f32.vlgmr.msra.gmra.mxu3 %v361_v20 }
 0x2ae   :  { %v470_v48 = vpop.f32.mrf.mxu1  ;;  %v510_v49 = vpop.f32.mrf.mxu0 }
 0x2ba   :  { %v450_v44 = vpop.f32.mrf.mxu2  ;;  %v490_v45 = vpop.f32.mrf.mxu3 }
 0x2bb   :  { %v451_v46 = vadd.f32 %v450_v44, %v429_v42  ;;  %v491_v47 = vadd.f32 %v490_v45, %v430_v43 }
 0x2bd   :  { %v471_v50 = vadd.f32 %v470_v48, %v451_v46  ;;  %v511_v51 = vadd.f32 %v510_v49, %v491_v47 }
 0x2bf   :  { %v513_v52 = vmax.f32 %v471_v50, 0.0  ;;  %v514_v53 = vmax.f32 %v511_v51, 0.0 }
 0x2c1   :  { %551 = vmatmul.f32.vlgmr.msrb.gmra.mxu2 %v513_v52  ;;  %592 = vmatmul.f32.vlgmr.msrb.gmra.mxu1 %v514_v53 }
 0x33e   :  { %v593_v55 = vpop.f32.mrf.mxu1 }
 0x33f   :  { %v594_v56 = vadd.f32 %v664_v54, %v593_v55 }
 0x341   :  { %596 = vst.msk [vmem:[#allocation8] sm:$0xf] %vm256_vm3, %v594_v56 }
 0x342   :  { %629 = dma.vmem_to_hbm [thread:$0]  %s625_s25, 64, %s627_s14, [#allocation7]  }
 0x344   :  { %v552_v58 = vpop.f32.mrf.mxu2 }
 0x345   :  { %v553_v59 = vadd.f32 %v665_v57, %v552_v58 }
 0x347   :  { %555 = vst.msk [vmem:[#allocation5] sm:$0xf] %vm256_vm3, %v553_v59 }
 0x348   :  { %607 = dma.vmem_to_hbm [thread:$0]  %s603_s3, 64, %s605_s9, [#allocation4]  }
 0x349   :  { %764 = dma.done.wait [#allocation4], 64  }
 0x34a   :  { %765 = vsyncadd [#allocation4], 4294967232 }
 0x34b   :  { %766 = dma.done.wait [#allocation7], 128  }
 0x34c   :  { %767 = vsyncadd [#allocation7], 4294967168 }
 0x34d   :  { %642 = vsyncpa [#allocation3], 1 }
 0x34e   :  { %643 = vsyncpa [#allocation4], 1 }
 0x34f   :  { %644 = vsyncpa [#allocation7], 1 }

</bundles_post_ra>
